<compile_context>
chip_gen: v7x
topology: tpu7x:2x2x1
jax: 0.10.0
libtpu: 0.0.40
codegen_flags: <defaults>
</compile_context>

<pallas_src>
import functools
import math

import jax
import jax.numpy as jnp
from jax.experimental import pallas as pl
from jax.experimental.pallas import tpu as pltpu


# ------------------------------ constants ---------------------------------- #

# All kernels here are MXU-free, HBM-bandwidth-bound streaming kernels; ~2 MiB
# (f32-equivalent) blocks sit on the ~85% HBM-roofline plateau while the
# double-buffered in+out working set stays well below the scoped-VMEM limit.
_TARGET_BLOCK_BYTES_F32 = 2 << 20          # per-block f32-equivalent footprint
_VMEM_LIMIT_BYTES = 48 * 1024 * 1024       # > v5e 16 MiB default, <= v7x physical


def _params(*semantics):
    return pltpu.CompilerParams(
        dimension_semantics=tuple(semantics),
        vmem_limit_bytes=_VMEM_LIMIT_BYTES)


# ------------------------------ helpers ------------------------------------ #

def _needs_f32_upcast(dtype):
    """Upcast transcendentals to f32 only on chips without a bf16 VPU/EUP."""
    if dtype == jnp.float32:
        return False
    if dtype != jnp.bfloat16:
        return True
    try:
        kind = jax.devices()[0].device_kind.lower()
    except Exception:  # pragma: no cover - defensive
        return True
    return not ("v6" in kind or "v7" in kind)


def _cmp_cast(x):
    """Comparison dtype for argmax: f32 for floats, i32 for integers."""
    if jnp.issubdtype(x.dtype, jnp.floating):
        return x.astype(jnp.float32)
    return x.astype(jnp.int32)


def _refine_recip(s):
    """EUP approximate reciprocal + one Newton step (near f32-exact)."""
    r = pl.reciprocal(s, approx=True)
    return r * (2.0 - s * r)


def _channel_layout(x, dim):
    shape = x.shape
    prefix = math.prod(shape[:dim]) if dim > 0 else 1
    c = shape[dim]
    suffix = math.prod(shape[dim + 1:]) if dim + 1 < x.ndim else 1
    return prefix, c, suffix


def _channel_tiles(prefix, c, suffix, target_bytes=_TARGET_BLOCK_BYTES_F32):
    """(prefix_tile, lane_tile) for a (prefix, C, suffix) channel reduction.

    `suffix` sits on lanes (multiple of 128, or the full axis). When the whole
    suffix fits in one lane tile we batch several prefix slices per block, so
    large-batch / small-spatial inputs don't degenerate into per-slice steps.
    Sized on the f32 intermediate (kernels upcast to f32).
    """
    target_elems = max(128, target_bytes // 4)
    t = max(128, (target_elems // max(1, c)) // 128 * 128)
    ts = suffix if suffix <= t else t
    pt = min(prefix, max(1, target_elems // max(1, c * ts)))
    return pt, ts


# ------------------------------ kernels ------------------------------------ #

def _elementwise_kernel(x_ref, o_ref, *, op, upcast):
    x = x_ref[...]
    if upcast:
        x = x.astype(jnp.float32)
    if op == "sigmoid":
        y = jax.nn.sigmoid(x)
    else:  # tanh
        y = jnp.tanh(x)
    o_ref[...] = y.astype(o_ref.dtype)


def _softmax_lane_kernel(x_ref, o_ref, *, log):
    # Numerically-stable (log-)softmax along the last (lane) axis.
    x = x_ref[...].astype(jnp.float32)
    m = jnp.max(x, axis=-1, keepdims=True)
    e = jnp.exp(x - m)
    s = jnp.sum(e, axis=-1, keepdims=True)
    if log:
        o_ref[...] = (x - m - jnp.log(s)).astype(o_ref.dtype)
    else:
        o_ref[...] = (e * _refine_recip(s)).astype(o_ref.dtype)


def _softmax_channel_kernel(x_ref, o_ref, *, log):
    # Block is (p_tile, C, T): reduce over the channel axis, T on lanes.
    x = x_ref[...].astype(jnp.float32)
    m = jnp.max(x, axis=1, keepdims=True)
    e = jnp.exp(x - m)
    s = jnp.sum(e, axis=1, keepdims=True)
    if log:
        o_ref[...] = (x - m - jnp.log(s)).astype(o_ref.dtype)
    else:
        o_ref[...] = (e * _refine_recip(s)).astype(o_ref.dtype)


def _argmax_channel_kernel(x_ref, o_ref):
    # Block (p_tile, C, T) -> first maximal channel, output (p_tile, 1, T).
    # TODO(synk): torch treats NaN as the maximum; NaN columns return 0 here.
    x = _cmp_cast(x_ref[...])
    c = x.shape[1]
    m = jnp.max(x, axis=1, keepdims=True)
    ch = jax.lax.broadcasted_iota(jnp.int32, x.shape, 1)
    masked = jnp.where(x == m, ch, jnp.int32(c))
    o_ref[...] = jnp.min(masked, axis=1, keepdims=True).astype(o_ref.dtype)


def _argmax_lane_kernel(x_ref, o_ref):
    # Generic last-axis argmax: block (tile, D) -> (tile, 1) indices.
    x = _cmp_cast(x_ref[...])
    d = x.shape[-1]
    m = jnp.max(x, axis=-1, keepdims=True)
    idx = jax.lax.broadcasted_iota(jnp.int32, x.shape, x.ndim - 1)
    masked = jnp.where(x == m, idx, jnp.int32(d))
    o_ref[...] = jnp.min(masked, axis=-1, keepdims=True).astype(o_ref.dtype)


def _flat_argmax_kernel(x_ref, o_ref, flat_sc, best_val, best_idx, *,
                        lane, total):
    # Chunked running argmax over the flattened tensor, carried across an
    # 'arbitrary' grid axis.  The per-block flat-index table is built once
    # (program_id == 0) into VMEM scratch, so steady-state VPU work is just
    # add + 2x(cmp+select) per element (reductions go to the XLU slot).
    # TODO(synk): torch treats NaN as the maximum; NaN inputs return 0 here.
    i = pl.program_id(0)
    x = _cmp_cast(x_ref[...])                      # (tile_rows, lane)
    tile_rows = x.shape[0]
    if jnp.issubdtype(x.dtype, jnp.floating):
        neg = float("-inf")
    else:
        neg = int(jnp.iinfo(jnp.int32).min)

    @pl.when(i == 0)
    def _init():
        best_val[...] = jnp.full(best_val.shape, neg, best_val.dtype)
        best_idx[...] = jnp.zeros(best_idx.shape, best_idx.dtype)
        row = jax.lax.broadcasted_iota(jnp.int32, (tile_rows, lane), 0)
        col = jax.lax.broadcasted_iota(jnp.int32, (tile_rows, lane), 1)
        flat_sc[...] = row * lane + col

    flat = flat_sc[...] + i * (tile_rows * lane)   # global flat indices
    valid = flat < total                           # masks lane pad / tail block
    xm = jnp.where(valid, x, neg)

    blk_max = jnp.max(jnp.max(xm, axis=1, keepdims=True), axis=0,
                      keepdims=True)               # (1, 1)
    big = jnp.int32(jnp.iinfo(jnp.int32).max)
    cand = jnp.where(xm == blk_max, flat, big)
    blk_idx = jnp.min(jnp.min(cand, axis=1, keepdims=True), axis=0,
                      keepdims=True)               # (1, 1)

    take = blk_max > best_val[...]                 # strict > keeps 1st occurrence
    best_idx[...] = jnp.where(take, blk_idx, best_idx[...])
    best_val[...] = jnp.where(take, blk_max, best_val[...])

    @pl.when(i == pl.num_programs(0) - 1)
    def _done():
        o_ref[...] = best_idx[...]


# --------------------------- pallas wrappers ------------------------------- #

def _run_rowwise(kernel, x2d, out_dtype, out_cols=None,
                 target_bytes=_TARGET_BLOCK_BYTES_F32):
    """Run `kernel` over a 2-D [rows, D] array, tiling rows (no padding).

    Blocks are sized on the f32 intermediate (kernels upcast), and the row
    tile is rounded to the dtype's sublane packing (8 f32 / 16 bf16 / 32 i8).
    """
    rows, d = x2d.shape
    out_cols = d if out_cols is None else out_cols
    per_row_f32 = max(1, d * 4)
    sub = max(8, 32 // jnp.dtype(x2d.dtype).itemsize)
    target = max(sub, ((target_bytes // per_row_f32) // sub) * sub)
    tile = rows if rows <= target else target      # full dim, or sub-multiple
    return pl.pallas_call(
        kernel,
        out_shape=jax.ShapeDtypeStruct((rows, out_cols), out_dtype),
        grid=(pl.cdiv(rows, tile),),
        in_specs=[pl.BlockSpec((tile, d), lambda i: (i, 0))],
        out_specs=pl.BlockSpec((tile, out_cols), lambda i: (i, 0)),
        compiler_params=_params("parallel"),
    )(x2d)


def _elementwise(x, op):
    if x.size == 0:
        return x
    upcast = _needs_f32_upcast(x.dtype)
    n = x.size
    flat = x.reshape(-1)
    pad = (-n) % 128
    if pad:
        # Pad once so every block is lane-dense; cheaper than masked stores
        # over the whole tensor.  Result is sliced back below.
        flat = jnp.pad(flat, (0, pad))
    total = flat.shape[0]
    lane = 128
    while lane < 1024 and total % (lane * 2) == 0 and total // (lane * 2) >= 8:
        lane *= 2
    x2 = flat.reshape(total // lane, lane)
    y2 = _run_rowwise(
        functools.partial(_elementwise_kernel, op=op, upcast=upcast),
        x2, x.dtype)
    y = y2.reshape(-1)
    if pad:
        y = y[:n]
    return y.reshape(x.shape)


def _softmax_channel(x, dim, log):
    prefix, c, suffix = _channel_layout(x, dim)
    x3 = x.reshape(prefix, c, suffix)               # free reshape, no transpose
    pt, ts = _channel_tiles(prefix, c, suffix)
    out = pl.pallas_call(
        functools.partial(_softmax_channel_kernel, log=log),
        out_shape=jax.ShapeDtypeStruct((prefix, c, suffix), x.dtype),
        grid=(pl.cdiv(prefix, pt), pl.cdiv(suffix, ts)),
        in_specs=[pl.BlockSpec((pt, c, ts), lambda p, s: (p, 0, s))],
        out_specs=pl.BlockSpec((pt, c, ts), lambda p, s: (p, 0, s)),
        compiler_params=_params("parallel", "parallel"),
    )(x3)
    return out.reshape(x.shape)


def _softmax(x, dim, log):
    if x.ndim == 0:
        return jnp.zeros_like(x) if log else jnp.ones_like(x)
    dim = dim % x.ndim
    if dim == x.ndim - 1:
        x2 = x.reshape(-1, x.shape[-1])
        y = _run_rowwise(functools.partial(_softmax_lane_kernel, log=log),
                         x2, x.dtype)
        return y.reshape(x.shape)
    return _softmax_channel(x, dim, log)


def _argmax_channel(x, dim):
    prefix, c, suffix = _channel_layout(x, dim)
    x3 = x.reshape(prefix, c, suffix)
    pt, ts = _channel_tiles(prefix, c, suffix)
    out = pl.pallas_call(
        _argmax_channel_kernel,
        out_shape=jax.ShapeDtypeStruct((prefix, 1, suffix), jnp.int32),
        grid=(pl.cdiv(prefix, pt), pl.cdiv(suffix, ts)),
        in_specs=[pl.BlockSpec((pt, c, ts), lambda p, s: (p, 0, s))],
        out_specs=pl.BlockSpec((pt, 1, ts), lambda p, s: (p, 0, s)),
        compiler_params=_params("parallel", "parallel"),
    )(x3)
    reduced_shape = x.shape[:dim] + x.shape[dim + 1:]
    return out.reshape(reduced_shape)


def _argmax_flat(x):
    n = x.size
    cmp_dtype = (jnp.float32 if jnp.issubdtype(x.dtype, jnp.floating)
                 else jnp.int32)
    flat = x.reshape(-1)
    lane = 128
    if n % lane != 0:
        # Rare fallback; padded tail is masked inside the kernel.
        flat = jnp.pad(flat, (0, (-n) % lane))
    rows = flat.shape[0] // lane
    x2 = flat.reshape(rows, lane)
    target = max(8, ((_TARGET_BLOCK_BYTES_F32 // (lane * 4)) // 8) * 8)
    tile = rows if rows <= target else target
    out = pl.pallas_call(
        functools.partial(_flat_argmax_kernel, lane=lane, total=n),
        out_shape=jax.ShapeDtypeStruct((1, 1), jnp.int32),
        grid=(pl.cdiv(rows, tile),),
        in_specs=[pl.BlockSpec((tile, lane), lambda i: (i, 0))],
        out_specs=pl.BlockSpec((1, 1), lambda i: (0, 0)),
        scratch_shapes=[pltpu.VMEM((tile, lane), jnp.int32),
                        pltpu.VMEM((1, 1), cmp_dtype),
                        pltpu.VMEM((1, 1), jnp.int32)],
        compiler_params=_params("arbitrary"),
    )(x2)
    # TODO(synk): torch.argmax returns int64; TPU kernel produces int32 (flat
    # index also overflows int32 for tensors with >= 2^31 elements).
    return out[0, 0]


def _argmax(x, dim):
    if dim is None:
        return _argmax_flat(x)
    d = dim % x.ndim
    if d == x.ndim - 1:
        x2 = x.reshape(-1, x.shape[-1])
        y = _run_rowwise(_argmax_lane_kernel, x2, jnp.int32, out_cols=1)
        return y.reshape(x.shape[:-1])
    return _argmax_channel(x, d)


# ------------------------- Activation module ------------------------------- #

class Activation:
    """JAX/Pallas counterpart of models.layer_ensembles.Activation."""

    def __init__(self, name, **params):
        if name is None or name == "identity":
            self._fn = lambda x: x                    # no kernel, no HBM copy
        elif name == "sigmoid":
            self._fn = lambda x: _elementwise(x, "sigmoid")
        elif name == "tanh":
            self._fn = lambda x: _elementwise(x, "tanh")
        elif name == "softmax2d":
            self._fn = lambda x: _softmax(x, 1, log=False)
        elif name == "softmax":
            dim = params.get("dim", -1)
            dim = -1 if dim is None else dim
            self._fn = lambda x: _softmax(x, dim, log=False)
        elif name == "logsoftmax":
            dim = params.get("dim", -1)
            dim = -1 if dim is None else dim
            self._fn = lambda x: _softmax(x, dim, log=True)
        elif name == "argmax":
            # NOTE: the original torch ArgMax never stores `dim`; we implement
            # the intended semantics (argmax over the given dim / flattened).
            dim = params.get("dim", None)
            self._fn = lambda x: _argmax(x, dim)
        elif name == "argmax2d":
            self._fn = lambda x: _argmax(x, 1)
        elif callable(name):
            self._fn = name(**params)
        else:
            raise ValueError(
                "Activation should be callable/sigmoid/softmax/logsoftmax/"
                "tanh/None; got {}".format(name))

    def __call__(self, x):
        return self._fn(x)


# --------------------------------- main ------------------------------------ #

if __name__ == "__main__":
    key = jax.random.PRNGKey(0)
    # NCHW, like the PyTorch module's typical segmentation-head input.
    x = jax.random.normal(key, (2, 4, 16, 16), dtype=jnp.float32)

    # identity (pure pass-through)
    y_id = Activation("identity")(x)
    assert y_id is x

    # sigmoid
    y_sig = jax.block_until_ready(Activation("sigmoid")(x))
    assert jnp.allclose(y_sig, jax.nn.sigmoid(x), atol=1e-5)

    # tanh
    y_tanh = jax.block_until_ready(Activation("tanh")(x))
    assert jnp.allclose(y_tanh, jnp.tanh(x), atol=1e-5)

    # softmax2d (softmax over channel dim=1)
    y_sm2d = jax.block_until_ready(Activation("softmax2d")(x))
    assert jnp.allclose(y_sm2d, jax.nn.softmax(x, axis=1), atol=1e-4)

    # softmax along an explicit (last) dim
    y_sm = jax.block_until_ready(Activation("softmax", dim=-1)(x))
    assert jnp.allclose(y_sm, jax.nn.softmax(x, axis=-1), atol=1e-4)

    # logsoftmax over channel dim
    y_lsm = jax.block_until_ready(Activation("logsoftmax", dim=1)(x))
    assert jnp.allclose(y_lsm, jax.nn.log_softmax(x, axis=1), atol=1e-4)

    # argmax2d (argmax over channel dim=1)
    y_am2d = jax.block_until_ready(Activation("argmax2d")(x))
    assert y_am2d.shape == (2, 16, 16)
    assert jnp.array_equal(y_am2d, jnp.argmax(x, axis=1).astype(jnp.int32))

    # argmax over the flattened tensor (dim=None)
    y_am = jax.block_until_ready(Activation("argmax")(x))
    assert int(y_am) == int(jnp.argmax(x))

    print("KERNEL_OK")
</pallas_src>

<mosaic_0001>
module attributes {stable_mosaic.version = 11 : i64} {
  func.func @_elementwise_kernel(%arg0: i32, %arg1: memref<8x256xf32, #tpu.memory_space<vmem>>, %arg2: memref<8x256xf32, #tpu.memory_space<vmem>>) attributes {dimension_semantics = [#tpu.dimension_semantics<parallel>], iteration_bounds = array<i64: 1>, scalar_prefetch = 0 : i64, scratch_operands = 0 : i64, tpu.core_type = #tpu.core_type<tc>, window_params = [{transform_indices = @transform_0, window_bounds = array<i64: 8, 256>}, {transform_indices = @transform_1, window_bounds = array<i64: 8, 256>}]} {
    %c0 = arith.constant 0 : index
    %c0_0 = arith.constant 0 : index
    %0 = vector.load %arg1[%c0, %c0_0] : memref<8x256xf32, #tpu.memory_space<vmem>>, vector<8x256xf32>
    %1 = arith.negf %0 : vector<8x256xf32>
    %2 = math.exp %1 : vector<8x256xf32>
    %cst = arith.constant 1.000000e+00 : f32
    %3 = vector.broadcast %cst : f32 to vector<8x256xf32>
    %4 = arith.addf %3, %2 : vector<8x256xf32>
    %5 = arith.divf %3, %4 : vector<8x256xf32>
    %c0_1 = arith.constant 0 : index
    %c0_2 = arith.constant 0 : index
    %6 = vector.load %arg2[%c0_1, %c0_2] : memref<8x256xf32, #tpu.memory_space<vmem>>, vector<8x256xf32>
    tpu.vector_store %arg2[%c0_1, %c0_2], %5 {strides = array<i32>} : memref<8x256xf32, #tpu.memory_space<vmem>>, vector<8x256xf32>,
    return
  }
  func.func @transform_0(%arg0: i32) -> (i32, i32) {
    %c0_i32 = arith.constant 0 : i32
    %c0_i32_0 = arith.constant 0 : i32
    return %arg0, %c0_i32 : i32, i32
  }
  func.func @transform_1(%arg0: i32) -> (i32, i32) {
    %c0_i32 = arith.constant 0 : i32
    %c0_i32_0 = arith.constant 0 : i32
    return %arg0, %c0_i32 : i32, i32
  }
}

</mosaic_0001>

<bundles_post_ra>
// kernel: tpu_custom_call.1
= control target key start
LH: loop header
LB: loop body
LE: loop exit
PB: predicated region body
PF: predicated region fallthrough
CT: control target
= control target key end

     0   :  { %6 = vsyncpa [#allocation3], 0  ;;  %s148_s0 = inlined_call_operand.hbm [shape: f32[8,256], index: 0, kind: input, shape index: {}]   ;;  %s149_s1 = inlined_call_operand.hbm [shape: f32[8,256], index: 1, kind: output, shape index: {}]  }
   0x1   :  { %7 = vsyncpa [#allocation4], 0  ;;  %s112_s6 = smov [#allocation2]   ;;  %s64_s10 = scalar_lea.hbm %s148_s0, 256 }
   0x2   :  { %s14_s7 = sshll.u32 %s112_s6, 4  ;;  %p65_p0 = scmp.ne.s32.totalorder %s148_s0, %s64_s10  ;;  %s15_s7 = int_to_ptr.vmem [resolvable:$true] %s14_s7 }
   0x3   :  { %p68_p1 = scmp.lt.u32.totalorder %s64_s10, %s148_s0 }
   0x5   :  { %p70_p2 = pnand %p68_p1, %p65_p0 }
   0x7   :  { %73 = shalt.err (!%p70_p2)
}
   0x8   :  { %s74_s15 = scalar_lea.vmem %s15_s7, 256  ;;  %p79_p4 = scmp.lt.s32.totalorder %s15_s7, %s15_s7 }
   0x9   :  { %p75_p3 = scmp.ne.s32.totalorder %s15_s7, %s74_s15  ;;  %p80_p5 = scmp.lt.s32.totalorder %s74_s15, %s74_s15 }
   0xb   :  { %p81_p6 = por %p80_p5, %p79_p4 }
   0xd   :  { %p82_p7 = pnand %p81_p6, %p75_p3 }
   0xf   :  { %85 = shalt.err (!%p82_p7)
}
  0x10   :  { %17 = dma.hbm_to_vmem [thread:$0]  %s148_s0, 256, %s15_s7, [#allocation3]  }
  0x11   :  { %108 = dma.done.wait [#allocation3], 256  }
  0x12   :  { %109 = vsyncadd [#allocation3], 4294967040  ;;  %v21_v0 = vld [vmem:[#allocation2] sm:$0xff]  ;;  %v22_v1 = vld [vmem:[#allocation2 + $0x8] sm:$0xff]  ;;  %s113_s18 = smov [#allocation5]  }
  0x13   :  { %v52_v2 = vmul.f32 -1.442695, %v21_v0  ;;  %v53_v3 = vmul.f32 -1.442695, %v22_v1  ;;  %s43_s19 = sshll.u32 %s113_s18, 4  ;;  %s44_s19 = int_to_ptr.vmem [resolvable:$true] %s43_s19 }
  0x14   :  { %s86_s0 = scalar_lea.vmem %s44_s19, 256  ;;  %p91_p9 = scmp.lt.s32.totalorder %s44_s19, %s44_s19 }
  0x15   :  { %56 = vpow2.f32 %v52_v2  ;;  %p87_p8 = scmp.ne.s32.totalorder %s44_s19, %s86_s0  ;;  %p92_p10 = scmp.lt.s32.totalorder %s86_s0, %s86_s0 }
  0x16   :  { %58 = vpow2.f32 %v53_v3 }
  0x17   :  { %p93_p11 = por %p92_p10, %p91_p9 }
  0x19   :  { %p94_p12 = pnand %p93_p11, %p87_p8 }
  0x1f   :  { %v57_v4 = vpop.eup %56 }
  0x20   :  { %v59_v5 = vpop.eup %58  ;;  %v29_v6 = vadd.f32 1.0, %v57_v4 }
  0x21   :  { %v30_v7 = vadd.f32 1.0, %v59_v5 }
  0x22   :  { %60 = vrcp.f32 %v29_v6 }
  0x23   :  { %62 = vrcp.f32 %v30_v7 }
  0x2c   :  { %v61_v8 = vpop.eup %60 }
  0x2d   :  { %v63_v9 = vpop.eup %62  ;;  %35 = vst [vmem:[#allocation5] sm:$0xff] %v61_v8 }
  0x2e   :  { %36 = vst [vmem:[#allocation5 + $0x8] sm:$0xff] %v63_v9 }
  0x2f   :  { %97 = shalt.err (!%p94_p12)
}
  0x30   :  { %s98_s22 = scalar_lea.hbm %s149_s1, 256 }
  0x31   :  { %p99_p13 = scmp.ne.s32.totalorder %s149_s1, %s98_s22  ;;  %p102_p0 = scmp.lt.u32.totalorder %s98_s22, %s149_s1 }
  0x33   :  { %p104_p1 = pnand %p102_p0, %p99_p13 }
  0x35   :  { %107 = shalt.err (!%p104_p1)
}
  0x36   :  { %46 = dma.vmem_to_hbm [thread:$0]  %s44_s19, 256, %s149_s1, [#allocation4]  }
  0x37   :  { %110 = dma.done.wait [#allocation4], 256  }
  0x38   :  { %111 = vsyncadd [#allocation4], 4294967040 }
  0x39   :  { %50 = vsyncpa [#allocation3], 1 }
  0x3a   :  { %51 = vsyncpa [#allocation4], 1 }

</bundles_post_ra>
